<compile_context>
chip_gen: v6e
topology: v6e:2x2x1
jax: 0.10.0
libtpu: 0.0.40
codegen_flags: <defaults>
</compile_context>

<pallas_src>
import functools
import math

import jax
import jax.numpy as jnp
from jax.experimental import pallas as pl
from jax.experimental.pallas import tpu as pltpu


# ------------------------------ small helpers ------------------------------ #

def _mm(a, b):
    """2-D MXU matmul, bf16-staged operands, f32 accumulation."""
    return jnp.dot(a.astype(jnp.bfloat16), b.astype(jnp.bfloat16),
                   preferred_element_type=jnp.float32)


def _bmm(pattern, a, b):
    """Batched (per-sequence) MXU matmul, bf16-staged, f32 accumulation."""
    return jnp.einsum(pattern, a.astype(jnp.bfloat16), b.astype(jnp.bfloat16),
                      preferred_element_type=jnp.float32)


def _layernorm(v, g, b, eps):
    mu = jnp.mean(v, axis=-1, keepdims=True)
    var = jnp.mean((v - mu) ** 2, axis=-1, keepdims=True)
    return (v - mu) * jax.lax.rsqrt(var + eps) * g + b


# --------------------------- parameter slab packing ------------------------ #

def _pack_slab(named):
    """Packs a dict of small 2-D f32 arrays into one (R, W) slab.

    Every section starts on an 8-row (sublane-tile) boundary so static slices
    inside the kernel never cross a tile in a misaligned way.  Returns
    (slab, layout) with layout[name] = (row_offset, n_rows, n_cols).
    """
    width = max(int(a.shape[1]) for a in named.values())
    layout, rows = {}, 0
    for name, a in named.items():
        r, c = int(a.shape[0]), int(a.shape[1])
        layout[name] = (rows, r, c)
        rows += ((r + 7) // 8) * 8
    slab = jnp.zeros((rows, width), jnp.float32)
    for name, a in named.items():
        off, r, c = layout[name]
        slab = slab.at[off:off + r, :c].set(a.astype(jnp.float32))
    return slab, layout


# ------------------------------ fused kernel ------------------------------- #

def _fused_kernel(xc_ref, emb_ref, slab_ref, out_ref, attn_ref, *,
                  layout, B, L, C, n_head, d_k):
    def P(name):                                   # static slab slice (free)
        off, r, c = layout[name]
        return slab_ref[off:off + r, :c]

    rows = B * L
    hdk = n_head * d_k

    # --- init_proj(x) + init_cond(cond) (fused) + diffusion projection ----- #
    h0 = _mm(xc_ref[...], P("w_init")) + P("b_init")             # (rows, C)
    demb = _mm(emb_ref[...], P("w_diff"))                        # (B, C)
    dexp = jnp.concatenate(
        [jnp.broadcast_to(demb[b:b + 1, :], (L, C)) for b in range(B)], axis=0)
    h0 = h0 + dexp                                               # (rows, C)

    # --- time encoder: pre-LN multi-head self-attention + residual --------- #
    hn = _layernorm(h0, P("ln1_g"), P("ln1_b"), 1e-5)            # (rows, C)
    qk = _mm(hn, P("w_qk"))                                      # (rows, 2*H*dk)
    qk3 = qk.reshape(B, L, 2 * hdk)
    eye3 = P("eye")[None, :, :]                                  # (1, L, L)
    inv_t = 1.0 / math.sqrt(d_k)

    attn_out = jnp.zeros((B, L, C), jnp.float32)
    for h in range(n_head):
        q_h = qk3[:, :, h * d_k:(h + 1) * d_k]                   # (B, L, dk)
        k_h = qk3[:, :, hdk + h * d_k: hdk + (h + 1) * d_k]      # (B, L, dk)
        s = _bmm("bqd,bkd->bqk", q_h, k_h) * inv_t               # (B, L, L)
        s = jnp.where(eye3 > 0.5, jnp.float32(-1e9), s)          # diagonal mask
        s = s - jnp.max(s, axis=-1, keepdims=True)
        p = jnp.exp(s)
        p = p * pl.reciprocal(jnp.sum(p, axis=-1, keepdims=True), approx=True)
        attn_ref[h] = p                                          # head weights
        # value projection + output fc folded into one (C, C) matrix per head
        vp = _mm(hn, P("m_v")[h * C:(h + 1) * C, :]).reshape(B, L, C)
        attn_out = attn_out + _bmm("bqk,bkd->bqd", p, vp)
    h1 = attn_out.reshape(rows, C) + h0                          # residual

    # --- position-wise feed-forward (pre-LN, ReLU) + residual --------------- #
    h1n = _layernorm(h1, P("ln2_g"), P("ln2_b"), 1e-6)
    ff = _mm(jnp.maximum(_mm(h1n, P("w_ff1")) + P("b_ff1"), 0.0),
             P("w_ff2")) + P("b_ff2")
    h2 = ff + h1

    # --- output_proj (1x1 conv, applied in (rows, C) orientation) ----------- #
    out_ref[...] = _mm(h2, P("w_out")) + P("b_out")              # (rows, d_model)


# --------------------------------- wrapper --------------------------------- #

def residual_encoder_layer_forward(x, cond, diffusion_emb, params, *,
                                   n_head, d_k):
    B, D, L = x.shape
    C = params["init_proj_w"].shape[0]
    E = diffusion_emb.shape[1]
    tp = params["time"]
    d_v = tp["w_vs"].shape[0] // n_head

    # XLA-side layout plumbing (fuses into surrounding ops): (B,D,L)->(B*L,2D)
    x_t = jnp.transpose(x, (0, 2, 1))
    cond_t = jnp.transpose(cond, (0, 2, 1))
    xc = jnp.concatenate([x_t, cond_t], axis=-1).reshape(B * L, 2 * D)

    # ---- fold & pack all parameters + constants into a single slab -------- #
    w_init = jnp.concatenate([params["init_proj_w"],
                              params["init_cond_w"]], axis=1).T      # (2D, C)
    b_init = (params["init_proj_b"] + params["init_cond_b"]
              + params["diff_b"])[None, :]                           # (1, C)
    w_qk = jnp.concatenate([tp["w_qs"], tp["w_ks"]], axis=0).T       # (C, 2*H*dk)
    m_v = jnp.concatenate(
        [tp["w_vs"][h * d_v:(h + 1) * d_v, :].T
         @ tp["fc"][:, h * d_v:(h + 1) * d_v].T for h in range(n_head)],
        axis=0)                                                      # (H*C, C)
    named = {
        "w_init": w_init, "b_init": b_init,
        "w_diff": params["diff_w"].T,                                # (E, C)
        "ln1_g": tp["ln_attn_g"][None, :], "ln1_b": tp["ln_attn_b"][None, :],
        "w_qk": w_qk, "m_v": m_v,
        "ln2_g": tp["ln_ffn_g"][None, :], "ln2_b": tp["ln_ffn_b"][None, :],
        "w_ff1": tp["w1"].T, "b_ff1": tp["b1"][None, :],
        "w_ff2": tp["w2"].T, "b_ff2": tp["b2"][None, :],
        "w_out": params["out_w"].T, "b_out": params["out_b"][None, :],
        "eye": jnp.eye(L, dtype=jnp.float32),                        # diag mask
    }
    slab, layout = _pack_slab(named)

    out, attn = pl.pallas_call(
        functools.partial(_fused_kernel, layout=layout, B=B, L=L, C=C,
                          n_head=n_head, d_k=d_k),
        out_shape=(jax.ShapeDtypeStruct((B * L, D), jnp.float32),
                   jax.ShapeDtypeStruct((n_head, B, L, L), jnp.float32)),
        grid=(1,),                       # whole batch folded into one step
        in_specs=[pl.BlockSpec((B * L, 2 * D), lambda i: (0, 0)),
                  pl.BlockSpec((B, E), lambda i: (0, 0)),
                  pl.BlockSpec(slab.shape, lambda i: (0, 0))],
        out_specs=(pl.BlockSpec((B * L, D), lambda i: (0, 0)),
                   pl.BlockSpec((n_head, B, L, L), lambda i: (0, 0, 0, 0))),
        # single step -> "arbitrary"; switch to a parallel batch axis only once
        # B*L is large enough that compute dominates the per-core launch cost.
        compiler_params=pltpu.CompilerParams(
            dimension_semantics=("arbitrary",)),
    )(xc, diffusion_emb, slab)

    y = jnp.transpose(out.reshape(B, L, D), (0, 2, 1))      # (B, d_model, L)
    attn_w = jnp.transpose(attn, (1, 0, 2, 3))              # (B, n_head, L, L)
    return y, attn_w


# ----------------------------------- main ----------------------------------- #

if __name__ == "__main__":
    B, D, L = 2, 16, 16          # batch, d_model, d_time
    C = 8                        # channels
    E = 16                       # diffusion embedding dim
    n_head, d_k, d_v = 2, 4, 4
    d_inner = 32

    key = jax.random.PRNGKey(0)
    ks = jax.random.split(key, 13)

    def nrm(k, shape, fan_in, gain=1.0):
        return (gain * jax.random.normal(k, shape) / math.sqrt(fan_in)).astype(jnp.float32)

    params = {
        "init_proj_w": nrm(ks[0], (C, D), D, math.sqrt(2.0)),   # kaiming-style
        "init_proj_b": jnp.zeros((C,), jnp.float32),
        "init_cond_w": nrm(ks[1], (C, D), D, math.sqrt(2.0)),
        "init_cond_b": jnp.zeros((C,), jnp.float32),
        "diff_w": nrm(ks[2], (C, E), E),
        "diff_b": jnp.zeros((C,), jnp.float32),
        "out_w": nrm(ks[3], (D, C), C, math.sqrt(2.0)),
        "out_b": jnp.zeros((D,), jnp.float32),
        "time": {
            "ln_attn_g": jnp.ones((C,), jnp.float32),
            "ln_attn_b": jnp.zeros((C,), jnp.float32),
            "w_qs": nrm(ks[4], (n_head * d_k, C), C),
            "w_ks": nrm(ks[5], (n_head * d_k, C), C),
            "w_vs": nrm(ks[6], (n_head * d_v, C), C),
            "fc": nrm(ks[7], (C, n_head * d_v), n_head * d_v),
            "ln_ffn_g": jnp.ones((C,), jnp.float32),
            "ln_ffn_b": jnp.zeros((C,), jnp.float32),
            "w1": nrm(ks[8], (d_inner, C), C),
            "b1": jnp.zeros((d_inner,), jnp.float32),
            "w2": nrm(ks[9], (C, d_inner), d_inner),
            "b2": jnp.zeros((C,), jnp.float32),
        },
    }

    x = jax.random.normal(ks[10], (B, D, L), jnp.float32)
    cond = jax.random.normal(ks[11], (B, D, L), jnp.float32)
    diffusion_emb = jax.random.normal(ks[12], (B, E), jnp.float32)

    fwd = jax.jit(functools.partial(residual_encoder_layer_forward,
                                    n_head=n_head, d_k=d_k))
    y, attn_w = fwd(x, cond, diffusion_emb, params)
    jax.block_until_ready(y)
    jax.block_until_ready(attn_w)

    assert y.shape == (B, D, L) and attn_w.shape == (B, n_head, L, L)
    assert bool(jnp.all(jnp.isfinite(y))) and bool(jnp.all(jnp.isfinite(attn_w)))
    print("KERNEL_OK")
</pallas_src>

<mosaic_0001>
module attributes {stable_mosaic.version = 11 : i64} {
  func.func @_fused_kernel(%arg0: i32, %arg1: memref<32x32xf32, #tpu.memory_space<vmem>>, %arg2: memref<2x16xf32, #tpu.memory_space<vmem>>, %arg3: memref<200x32xf32, #tpu.memory_space<vmem>>, %arg4: memref<32x16xf32, #tpu.memory_space<vmem>>, %arg5: memref<2x2x16x16xf32, #tpu.memory_space<vmem>>) attributes {dimension_semantics = [#tpu.dimension_semantics<arbitrary>], iteration_bounds = array<i64: 1>, scalar_prefetch = 0 : i64, scratch_operands = 0 : i64, tpu.core_type = #tpu.core_type<tc>, window_params = [{pipeline_mode = #tpu.pipeline_mode<synchronous>, transform_indices = @transform_0, window_bounds = array<i64: 32, 32>}, {pipeline_mode = #tpu.pipeline_mode<synchronous>, transform_indices = @transform_1, window_bounds = array<i64: 2, 16>}, {pipeline_mode = #tpu.pipeline_mode<synchronous>, transform_indices = @transform_2, window_bounds = array<i64: 200, 32>}, {pipeline_mode = #tpu.pipeline_mode<synchronous>, transform_indices = @transform_3, window_bounds = array<i64: 32, 16>}, {pipeline_mode = #tpu.pipeline_mode<synchronous>, transform_indices = @transform_4, window_bounds = array<i64: 2, 2, 16, 16>}]} {
    %c0 = arith.constant 0 : index
    %c0_0 = arith.constant 0 : index
    %0 = vector.load %arg1[%c0, %c0_0] : memref<32x32xf32, #tpu.memory_space<vmem>>, vector<32x32xf32>
    %c0_1 = arith.constant 0 : index
    %c0_2 = arith.constant 0 : index
    %1 = vector.load %arg3[%c0_1, %c0_2] : memref<200x32xf32, #tpu.memory_space<vmem>>, vector<32x8xf32>
    %2 = arith.truncf %0 : vector<32x32xf32> to vector<32x32xbf16>
    %3 = arith.truncf %1 : vector<32x8xf32> to vector<32x8xbf16>
    %cst = arith.constant dense<0.000000e+00> : vector<32x8xf32>
    %4 = tpu.matmul %2, %3, %cst {dimension_numbers = #tpu.dot_dimension_numbers<[1], [0], [0], [1], [0, 0, 1, 1], [], []>} : vector<32x32xbf16>, vector<32x8xbf16>, vector<32x8xf32> -> vector<32x8xf32>
    %c32 = arith.constant 32 : index
    %c0_3 = arith.constant 0 : index
    %5 = vector.load %arg3[%c32, %c0_3] : memref<200x32xf32, #tpu.memory_space<vmem>>, vector<1x8xf32>
    %6 = vector.broadcast %5 : vector<1x8xf32> to vector<32x8xf32>
    %7 = arith.addf %4, %6 : vector<32x8xf32>
    %c0_4 = arith.constant 0 : index
    %c0_5 = arith.constant 0 : index
    %8 = vector.load %arg2[%c0_4, %c0_5] : memref<2x16xf32, #tpu.memory_space<vmem>>, vector<2x16xf32>
    %c40 = arith.constant 40 : index
    %c0_6 = arith.constant 0 : index
    %9 = vector.load %arg3[%c40, %c0_6] : memref<200x32xf32, #tpu.memory_space<vmem>>, vector<16x8xf32>
    %10 = arith.truncf %8 : vector<2x16xf32> to vector<2x16xbf16>
    %11 = arith.truncf %9 : vector<16x8xf32> to vector<16x8xbf16>
    %cst_7 = arith.constant dense<0.000000e+00> : vector<2x8xf32>
    %12 = tpu.matmul %10, %11, %cst_7 {dimension_numbers = #tpu.dot_dimension_numbers<[1], [0], [0], [1], [0, 0, 1, 1], [], []>} : vector<2x16xbf16>, vector<16x8xbf16>, vector<2x8xf32> -> vector<2x8xf32>
    %13 = vector.extract_strided_slice %12 {offsets = [0, 0], sizes = [1, 8], strides = [1, 1]} : vector<2x8xf32> to vector<1x8xf32>
    %14 = vector.shape_cast %13 : vector<1x8xf32> to vector<1x8xf32>
    %15 = vector.broadcast %14 : vector<1x8xf32> to vector<16x8xf32>
    %16 = vector.extract_strided_slice %12 {offsets = [1, 0], sizes = [1, 8], strides = [1, 1]} : vector<2x8xf32> to vector<1x8xf32>
    %17 = vector.shape_cast %16 : vector<1x8xf32> to vector<1x8xf32>
    %18 = vector.broadcast %17 : vector<1x8xf32> to vector<16x8xf32>
    %19 = tpu.concatenate %15, %18 in 0 : vector<16x8xf32>, vector<16x8xf32> -> vector<32x8xf32>
    %20 = arith.addf %7, %19 : vector<32x8xf32>
    %c56 = arith.constant 56 : index
    %c0_8 = arith.constant 0 : index
    %21 = vector.load %arg3[%c56, %c0_8] : memref<200x32xf32, #tpu.memory_space<vmem>>, vector<1x8xf32>
    %c64 = arith.constant 64 : index
    %c0_9 = arith.constant 0 : index
    %22 = vector.load %arg3[%c64, %c0_9] : memref<200x32xf32, #tpu.memory_space<vmem>>, vector<1x8xf32>
    %cst_10 = arith.constant dense<0.000000e+00> : vector<32xf32>
    %23 = vector.multi_reduction <add>, %20, %cst_10 [1] : vector<32x8xf32> to vector<32xf32>
    %24 = vector.shape_cast %23 : vector<32xf32> to vector<32x1xf32>
    %cst_11 = arith.constant 8.000000e+00 : f32
    %25 = vector.broadcast %cst_11 : f32 to vector<32x1xf32>
    %26 = arith.divf %24, %25 : vector<32x1xf32>
    %27 = vector.broadcast %26 : vector<32x1xf32> to vector<32x8xf32>
    %28 = arith.subf %20, %27 : vector<32x8xf32>
    %29 = arith.mulf %28, %28 : vector<32x8xf32>
    %cst_12 = arith.constant dense<0.000000e+00> : vector<32xf32>
    %30 = vector.multi_reduction <add>, %29, %cst_12 [1] : vector<32x8xf32> to vector<32xf32>
    %31 = vector.shape_cast %30 : vector<32xf32> to vector<32x1xf32>
    %cst_13 = arith.constant 8.000000e+00 : f32
    %32 = vector.broadcast %cst_13 : f32 to vector<32x1xf32>
    %33 = arith.divf %31, %32 : vector<32x1xf32>
    %34 = vector.broadcast %26 : vector<32x1xf32> to vector<32x8xf32>
    %35 = arith.subf %20, %34 : vector<32x8xf32>
    %cst_14 = arith.constant 9.99999974E-6 : f32
    %36 = vector.broadcast %cst_14 : f32 to vector<32x1xf32>
    %37 = arith.addf %33, %36 : vector<32x1xf32>
    %38 = math.rsqrt %37 : vector<32x1xf32>
    %39 = vector.broadcast %38 : vector<32x1xf32> to vector<32x8xf32>
    %40 = arith.mulf %35, %39 : vector<32x8xf32>
    %41 = vector.broadcast %21 : vector<1x8xf32> to vector<32x8xf32>
    %42 = arith.mulf %40, %41 : vector<32x8xf32>
    %43 = vector.broadcast %22 : vector<1x8xf32> to vector<32x8xf32>
    %44 = arith.addf %42, %43 : vector<32x8xf32>
    %c72 = arith.constant 72 : index
    %c0_15 = arith.constant 0 : index
    %45 = vector.load %arg3[%c72, %c0_15] : memref<200x32xf32, #tpu.memory_space<vmem>>, vector<8x16xf32>
    %46 = arith.truncf %44 : vector<32x8xf32> to vector<32x8xbf16>
    %47 = arith.truncf %45 : vector<8x16xf32> to vector<8x16xbf16>
    %cst_16 = arith.constant dense<0.000000e+00> : vector<32x16xf32>
    %48 = tpu.matmul %46, %47, %cst_16 {dimension_numbers = #tpu.dot_dimension_numbers<[1], [0], [0], [1], [0, 0, 1, 1], [], []>} : vector<32x8xbf16>, vector<8x16xbf16>, vector<32x16xf32> -> vector<32x16xf32>
    %49 = vector.shape_cast %48 : vector<32x16xf32> to vector<2x16x16xf32>
    %c184 = arith.constant 184 : index
    %c0_17 = arith.constant 0 : index
    %50 = vector.load %arg3[%c184, %c0_17] : memref<200x32xf32, #tpu.memory_space<vmem>>, vector<16x16xf32>
    %51 = vector.shape_cast %50 : vector<16x16xf32> to vector<1x16x16xf32>
    %cst_18 = arith.constant 0.000000e+00 : f32
    %52 = vector.broadcast %cst_18 : f32 to vector<2x16x8xf32>
    %53 = vector.extract_strided_slice %49 {offsets = [0, 0, 0], sizes = [2, 16, 4], strides = [1, 1, 1]} : vector<2x16x16xf32> to vector<2x16x4xf32>
    %54 = vector.extract_strided_slice %49 {offsets = [0, 0, 8], sizes = [2, 16, 4], strides = [1, 1, 1]} : vector<2x16x16xf32> to vector<2x16x4xf32>
    %55 = arith.truncf %53 : vector<2x16x4xf32> to vector<2x16x4xbf16>
    %56 = arith.truncf %54 : vector<2x16x4xf32> to vector<2x16x4xbf16>
    "tpu.trace_start"() <{level = 10 : i32, message = "bqd,bkd->bqk"}> : () -> ()
    %cst_19 = arith.constant dense<0.000000e+00> : vector<2x16x16xf32>
    %57 = tpu.matmul %55, %56, %cst_19 {dimension_numbers = #tpu.dot_dimension_numbers<[2], [2], [1], [1], [0, 0, 0, 1, 1, 1], [0], [0]>} : vector<2x16x4xbf16>, vector<2x16x4xbf16>, vector<2x16x16xf32> -> vector<2x16x16xf32>
    "tpu.trace_stop"() : () -> ()
    %cst_20 = arith.constant 5.000000e-01 : f32
    %58 = vector.broadcast %cst_20 : f32 to vector<2x16x16xf32>
    %59 = arith.mulf %57, %58 : vector<2x16x16xf32>
    %cst_21 = arith.constant 5.000000e-01 : f32
    %60 = vector.broadcast %cst_21 : f32 to vector<1x16x16xf32>
    %61 = arith.cmpf ogt, %51, %60 : vector<1x16x16xf32>
    %cst_22 = arith.constant -1.000000e+09 : f32
    %62 = vector.shape_cast %61 : vector<1x16x16xi1> to vector<1x16x16xi1>
    %63 = vector.broadcast %62 : vector<1x16x16xi1> to vector<2x16x16xi1>
    %64 = vector.broadcast %cst_22 : f32 to vector<2x16x16xf32>
    %65 = arith.select %63, %64, %59 : vector<2x16x16xi1>, vector<2x16x16xf32>
    %cst_23 = arith.constant dense<0xFF800000> : vector<2x16xf32>
    %66 = vector.multi_reduction <maximumf>, %65, %cst_23 [2] : vector<2x16x16xf32> to vector<2x16xf32>
    %67 = vector.shape_cast %66 : vector<2x16xf32> to vector<2x16x1xf32>
    %68 = vector.broadcast %67 : vector<2x16x1xf32> to vector<2x16x16xf32>
    %69 = arith.subf %65, %68 : vector<2x16x16xf32>
    %70 = math.exp %69 : vector<2x16x16xf32>
    %cst_24 = arith.constant dense<0.000000e+00> : vector<2x16xf32>
    %71 = vector.multi_reduction <add>, %70, %cst_24 [2] : vector<2x16x16xf32> to vector<2x16xf32>
    %72 = vector.shape_cast %71 : vector<2x16xf32> to vector<2x16x1xf32>
    %73 = tpu.reciprocal %72 {approx = true} : vector<2x16x1xf32> -> vector<2x16x1xf32>
    %74 = vector.broadcast %73 : vector<2x16x1xf32> to vector<2x16x16xf32>
    %75 = arith.mulf %70, %74 : vector<2x16x16xf32>
    %c0_25 = arith.constant 0 : index
    %c0_26 = arith.constant 0 : index
    %c0_27 = arith.constant 0 : index
    %c0_28 = arith.constant 0 : index
    %76 = vector.load %arg5[%c0_25, %c0_26, %c0_27, %c0_28] : memref<2x2x16x16xf32, #tpu.memory_space<vmem>>, vector<1x2x16x16xf32>
    %77 = vector.shape_cast %76 : vector<1x2x16x16xf32> to vector<2x16x16xf32>
    %78 = vector.shape_cast %75 : vector<2x16x16xf32> to vector<1x2x16x16xf32>
    tpu.vector_store %arg5[%c0_25, %c0_26, %c0_27, %c0_28], %78 {strides = array<i32>} : memref<2x2x16x16xf32, #tpu.memory_space<vmem>>, vector<1x2x16x16xf32>,
    %c80 = arith.constant 80 : index
    %c0_29 = arith.constant 0 : index
    %79 = vector.load %arg3[%c80, %c0_29] : memref<200x32xf32, #tpu.memory_space<vmem>>, vector<16x8xf32>
    %80 = vector.extract_strided_slice %79 {offsets = [0, 0], sizes = [8, 8], strides = [1, 1]} : vector<16x8xf32> to vector<8x8xf32>
    %81 = arith.truncf %44 : vector<32x8xf32> to vector<32x8xbf16>
    %82 = arith.truncf %80 : vector<8x8xf32> to vector<8x8xbf16>
    %cst_30 = arith.constant dense<0.000000e+00> : vector<32x8xf32>
    %83 = tpu.matmul %81, %82, %cst_30 {dimension_numbers = #tpu.dot_dimension_numbers<[1], [0], [0], [1], [0, 0, 1, 1], [], []>} : vector<32x8xbf16>, vector<8x8xbf16>, vector<32x8xf32> -> vector<32x8xf32>
    %84 = vector.shape_cast %83 : vector<32x8xf32> to vector<2x16x8xf32>
    %85 = arith.truncf %75 : vector<2x16x16xf32> to vector<2x16x16xbf16>
    %86 = arith.truncf %84 : vector<2x16x8xf32> to vector<2x16x8xbf16>
    "tpu.trace_start"() <{level = 10 : i32, message = "bqk,bkd->bqd"}> : () -> ()
    %cst_31 = arith.constant dense<0.000000e+00> : vector<2x16x8xf32>
    %87 = tpu.matmul %85, %86, %cst_31 {dimension_numbers = #tpu.dot_dimension_numbers<[2], [1], [1], [2], [0, 0, 0, 1, 1, 2], [0], [0]>} : vector<2x16x16xbf16>, vector<2x16x8xbf16>, vector<2x16x8xf32> -> vector<2x16x8xf32>
    "tpu.trace_stop"() : () -> ()
    %88 = arith.addf %52, %87 : vector<2x16x8xf32>
    %89 = vector.extract_strided_slice %49 {offsets = [0, 0, 4], sizes = [2, 16, 4], strides = [1, 1, 1]} : vector<2x16x16xf32> to vector<2x16x4xf32>
    %90 = vector.extract_strided_slice %49 {offsets = [0, 0, 12], sizes = [2, 16, 4], strides = [1, 1, 1]} : vector<2x16x16xf32> to vector<2x16x4xf32>
    %91 = arith.truncf %89 : vector<2x16x4xf32> to vector<2x16x4xbf16>
    %92 = arith.truncf %90 : vector<2x16x4xf32> to vector<2x16x4xbf16>
    "tpu.trace_start"() <{level = 10 : i32, message = "bqd,bkd->bqk"}> : () -> ()
    %cst_32 = arith.constant dense<0.000000e+00> : vector<2x16x16xf32>
    %93 = tpu.matmul %91, %92, %cst_32 {dimension_numbers = #tpu.dot_dimension_numbers<[2], [2], [1], [1], [0, 0, 0, 1, 1, 1], [0], [0]>} : vector<2x16x4xbf16>, vector<2x16x4xbf16>, vector<2x16x16xf32> -> vector<2x16x16xf32>
    "tpu.trace_stop"() : () -> ()
    %cst_33 = arith.constant 5.000000e-01 : f32
    %94 = vector.broadcast %cst_33 : f32 to vector<2x16x16xf32>
    %95 = arith.mulf %93, %94 : vector<2x16x16xf32>
    %cst_34 = arith.constant 5.000000e-01 : f32
    %96 = vector.broadcast %cst_34 : f32 to vector<1x16x16xf32>
    %97 = arith.cmpf ogt, %51, %96 : vector<1x16x16xf32>
    %cst_35 = arith.constant -1.000000e+09 : f32
    %98 = vector.shape_cast %97 : vector<1x16x16xi1> to vector<1x16x16xi1>
    %99 = vector.broadcast %98 : vector<1x16x16xi1> to vector<2x16x16xi1>
    %100 = vector.broadcast %cst_35 : f32 to vector<2x16x16xf32>
    %101 = arith.select %99, %100, %95 : vector<2x16x16xi1>, vector<2x16x16xf32>
    %cst_36 = arith.constant dense<0xFF800000> : vector<2x16xf32>
    %102 = vector.multi_reduction <maximumf>, %101, %cst_36 [2] : vector<2x16x16xf32> to vector<2x16xf32>
    %103 = vector.shape_cast %102 : vector<2x16xf32> to vector<2x16x1xf32>
    %104 = vector.broadcast %103 : vector<2x16x1xf32> to vector<2x16x16xf32>
    %105 = arith.subf %101, %104 : vector<2x16x16xf32>
    %106 = math.exp %105 : vector<2x16x16xf32>
    %cst_37 = arith.constant dense<0.000000e+00> : vector<2x16xf32>
    %107 = vector.multi_reduction <add>, %106, %cst_37 [2] : vector<2x16x16xf32> to vector<2x16xf32>
    %108 = vector.shape_cast %107 : vector<2x16xf32> to vector<2x16x1xf32>
    %109 = tpu.reciprocal %108 {approx = true} : vector<2x16x1xf32> -> vector<2x16x1xf32>
    %110 = vector.broadcast %109 : vector<2x16x1xf32> to vector<2x16x16xf32>
    %111 = arith.mulf %106, %110 : vector<2x16x16xf32>
    %c1 = arith.constant 1 : index
    %c0_38 = arith.constant 0 : index
    %c0_39 = arith.constant 0 : index
    %c0_40 = arith.constant 0 : index
    %112 = vector.load %arg5[%c1, %c0_38, %c0_39, %c0_40] : memref<2x2x16x16xf32, #tpu.memory_space<vmem>>, vector<1x2x16x16xf32>
    %113 = vector.shape_cast %112 : vector<1x2x16x16xf32> to vector<2x16x16xf32>
    %114 = vector.shape_cast %111 : vector<2x16x16xf32> to vector<1x2x16x16xf32>
    tpu.vector_store %arg5[%c1, %c0_38, %c0_39, %c0_40], %114 {strides = array<i32>} : memref<2x2x16x16xf32, #tpu.memory_space<vmem>>, vector<1x2x16x16xf32>,
    %c80_41 = arith.constant 80 : index
    %c0_42 = arith.constant 0 : index
    %115 = vector.load %arg3[%c80_41, %c0_42] : memref<200x32xf32, #tpu.memory_space<vmem>>, vector<16x8xf32>
    %116 = vector.extract_strided_slice %115 {offsets = [8, 0], sizes = [8, 8], strides = [1, 1]} : vector<16x8xf32> to vector<8x8xf32>
    %117 = arith.truncf %44 : vector<32x8xf32> to vector<32x8xbf16>
    %118 = arith.truncf %116 : vector<8x8xf32> to vector<8x8xbf16>
    %cst_43 = arith.constant dense<0.000000e+00> : vector<32x8xf32>
    %119 = tpu.matmul %117, %118, %cst_43 {dimension_numbers = #tpu.dot_dimension_numbers<[1], [0], [0], [1], [0, 0, 1, 1], [], []>} : vector<32x8xbf16>, vector<8x8xbf16>, vector<32x8xf32> -> vector<32x8xf32>
    %120 = vector.shape_cast %119 : vector<32x8xf32> to vector<2x16x8xf32>
    %121 = arith.truncf %111 : vector<2x16x16xf32> to vector<2x16x16xbf16>
    %122 = arith.truncf %120 : vector<2x16x8xf32> to vector<2x16x8xbf16>
    "tpu.trace_start"() <{level = 10 : i32, message = "bqk,bkd->bqd"}> : () -> ()
    %cst_44 = arith.constant dense<0.000000e+00> : vector<2x16x8xf32>
    %123 = tpu.matmul %121, %122, %cst_44 {dimension_numbers = #tpu.dot_dimension_numbers<[2], [1], [1], [2], [0, 0, 0, 1, 1, 2], [0], [0]>} : vector<2x16x16xbf16>, vector<2x16x8xbf16>, vector<2x16x8xf32> -> vector<2x16x8xf32>
    "tpu.trace_stop"() : () -> ()
    %124 = arith.addf %88, %123 : vector<2x16x8xf32>
    %125 = vector.shape_cast %124 : vector<2x16x8xf32> to vector<32x8xf32>
    %126 = arith.addf %125, %20 : vector<32x8xf32>
    %c96 = arith.constant 96 : index
    %c0_45 = arith.constant 0 : index
    %127 = vector.load %arg3[%c96, %c0_45] : memref<200x32xf32, #tpu.memory_space<vmem>>, vector<1x8xf32>
    %c104 = arith.constant 104 : index
    %c0_46 = arith.constant 0 : index
    %128 = vector.load %arg3[%c104, %c0_46] : memref<200x32xf32, #tpu.memory_space<vmem>>, vector<1x8xf32>
    %cst_47 = arith.constant dense<0.000000e+00> : vector<32xf32>
    %129 = vector.multi_reduction <add>, %126, %cst_47 [1] : vector<32x8xf32> to vector<32xf32>
    %130 = vector.shape_cast %129 : vector<32xf32> to vector<32x1xf32>
    %cst_48 = arith.constant 8.000000e+00 : f32
    %131 = vector.broadcast %cst_48 : f32 to vector<32x1xf32>
    %132 = arith.divf %130, %131 : vector<32x1xf32>
    %133 = vector.broadcast %132 : vector<32x1xf32> to vector<32x8xf32>
    %134 = arith.subf %126, %133 : vector<32x8xf32>
    %135 = arith.mulf %134, %134 : vector<32x8xf32>
    %cst_49 = arith.constant dense<0.000000e+00> : vector<32xf32>
    %136 = vector.multi_reduction <add>, %135, %cst_49 [1] : vector<32x8xf32> to vector<32xf32>
    %137 = vector.shape_cast %136 : vector<32xf32> to vector<32x1xf32>
    %cst_50 = arith.constant 8.000000e+00 : f32
    %138 = vector.broadcast %cst_50 : f32 to vector<32x1xf32>
    %139 = arith.divf %137, %138 : vector<32x1xf32>
    %140 = vector.broadcast %132 : vector<32x1xf32> to vector<32x8xf32>
    %141 = arith.subf %126, %140 : vector<32x8xf32>
    %cst_51 = arith.constant 9.99999997E-7 : f32
    %142 = vector.broadcast %cst_51 : f32 to vector<32x1xf32>
    %143 = arith.addf %139, %142 : vector<32x1xf32>
    %144 = math.rsqrt %143 : vector<32x1xf32>
    %145 = vector.broadcast %144 : vector<32x1xf32> to vector<32x8xf32>
    %146 = arith.mulf %141, %145 : vector<32x8xf32>
    %147 = vector.broadcast %127 : vector<1x8xf32> to vector<32x8xf32>
    %148 = arith.mulf %146, %147 : vector<32x8xf32>
    %149 = vector.broadcast %128 : vector<1x8xf32> to vector<32x8xf32>
    %150 = arith.addf %148, %149 : vector<32x8xf32>
    %c112 = arith.constant 112 : index
    %c0_52 = arith.constant 0 : index
    %151 = vector.load %arg3[%c112, %c0_52] : memref<200x32xf32, #tpu.memory_space<vmem>>, vector<8x32xf32>
    %152 = arith.truncf %150 : vector<32x8xf32> to vector<32x8xbf16>
    %153 = arith.truncf %151 : vector<8x32xf32> to vector<8x32xbf16>
    %cst_53 = arith.constant dense<0.000000e+00> : vector<32x32xf32>
    %154 = tpu.matmul %152, %153, %cst_53 {dimension_numbers = #tpu.dot_dimension_numbers<[1], [0], [0], [1], [0, 0, 1, 1], [], []>} : vector<32x8xbf16>, vector<8x32xbf16>, vector<32x32xf32> -> vector<32x32xf32>
    %c120 = arith.constant 120 : index
    %c0_54 = arith.constant 0 : index
    %155 = vector.load %arg3[%c120, %c0_54] : memref<200x32xf32, #tpu.memory_space<vmem>>, vector<1x32xf32>
    %156 = vector.broadcast %155 : vector<1x32xf32> to vector<32x32xf32>
    %157 = arith.addf %154, %156 : vector<32x32xf32>
    %cst_55 = arith.constant 0.000000e+00 : f32
    %158 = vector.broadcast %cst_55 : f32 to vector<32x32xf32>
    %159 = arith.maximumf %157, %158 : vector<32x32xf32>
    %c128 = arith.constant 128 : index
    %c0_56 = arith.constant 0 : index
    %160 = vector.load %arg3[%c128, %c0_56] : memref<200x32xf32, #tpu.memory_space<vmem>>, vector<32x8xf32>
    %161 = arith.truncf %159 : vector<32x32xf32> to vector<32x32xbf16>
    %162 = arith.truncf %160 : vector<32x8xf32> to vector<32x8xbf16>
    %cst_57 = arith.constant dense<0.000000e+00> : vector<32x8xf32>
    %163 = tpu.matmul %161, %162, %cst_57 {dimension_numbers = #tpu.dot_dimension_numbers<[1], [0], [0], [1], [0, 0, 1, 1], [], []>} : vector<32x32xbf16>, vector<32x8xbf16>, vector<32x8xf32> -> vector<32x8xf32>
    %c160 = arith.constant 160 : index
    %c0_58 = arith.constant 0 : index
    %164 = vector.load %arg3[%c160, %c0_58] : memref<200x32xf32, #tpu.memory_space<vmem>>, vector<1x8xf32>
    %165 = vector.broadcast %164 : vector<1x8xf32> to vector<32x8xf32>
    %166 = arith.addf %163, %165 : vector<32x8xf32>
    %167 = arith.addf %166, %126 : vector<32x8xf32>
    %c168 = arith.constant 168 : index
    %c0_59 = arith.constant 0 : index
    %168 = vector.load %arg3[%c168, %c0_59] : memref<200x32xf32, #tpu.memory_space<vmem>>, vector<8x16xf32>
    %169 = arith.truncf %167 : vector<32x8xf32> to vector<32x8xbf16>
    %170 = arith.truncf %168 : vector<8x16xf32> to vector<8x16xbf16>
    %cst_60 = arith.constant dense<0.000000e+00> : vector<32x16xf32>
    %171 = tpu.matmul %169, %170, %cst_60 {dimension_numbers = #tpu.dot_dimension_numbers<[1], [0], [0], [1], [0, 0, 1, 1], [], []>} : vector<32x8xbf16>, vector<8x16xbf16>, vector<32x16xf32> -> vector<32x16xf32>
    %c176 = arith.constant 176 : index
    %c0_61 = arith.constant 0 : index
    %172 = vector.load %arg3[%c176, %c0_61] : memref<200x32xf32, #tpu.memory_space<vmem>>, vector<1x16xf32>
    %173 = vector.broadcast %172 : vector<1x16xf32> to vector<32x16xf32>
    %174 = arith.addf %171, %173 : vector<32x16xf32>
    %c0_62 = arith.constant 0 : index
    %c0_63 = arith.constant 0 : index
    %175 = vector.load %arg4[%c0_62, %c0_63] : memref<32x16xf32, #tpu.memory_space<vmem>>, vector<32x16xf32>
    tpu.vector_store %arg4[%c0_62, %c0_63], %174 {strides = array<i32>} : memref<32x16xf32, #tpu.memory_space<vmem>>, vector<32x16xf32>,
    return
  }
  func.func @transform_0(%arg0: i32) -> (i32, i32) {
    %c0_i32 = arith.constant 0 : i32
    %c0_i32_0 = arith.constant 0 : i32
    %c0_i32_1 = arith.constant 0 : i32
    return %c0_i32, %c0_i32_0 : i32, i32
  }
  func.func @transform_1(%arg0: i32) -> (i32, i32) {
    %c0_i32 = arith.constant 0 : i32
    %c0_i32_0 = arith.constant 0 : i32
    %c0_i32_1 = arith.constant 0 : i32
    return %c0_i32, %c0_i32_0 : i32, i32
  }
  func.func @transform_2(%arg0: i32) -> (i32, i32) {
    %c0_i32 = arith.constant 0 : i32
    %c0_i32_0 = arith.constant 0 : i32
    %c0_i32_1 = arith.constant 0 : i32
    return %c0_i32, %c0_i32_0 : i32, i32
  }
  func.func @transform_3(%arg0: i32) -> (i32, i32) {
    %c0_i32 = arith.constant 0 : i32
    %c0_i32_0 = arith.constant 0 : i32
    %c0_i32_1 = arith.constant 0 : i32
    return %c0_i32, %c0_i32_0 : i32, i32
  }
  func.func @transform_4(%arg0: i32) -> (i32, i32, i32, i32) {
    %c0_i32 = arith.constant 0 : i32
    %c0_i32_0 = arith.constant 0 : i32
    %c0_i32_1 = arith.constant 0 : i32
    %c0_i32_2 = arith.constant 0 : i32
    %c0_i32_3 = arith.constant 0 : i32
    return %c0_i32, %c0_i32_0, %c0_i32_1, %c0_i32_2 : i32, i32, i32, i32
  }
}

</mosaic_0001>

<bundles_post_ra>
// kernel: residual_encoder_layer_forward.1
= control target key start
LH: loop header
LB: loop body
LE: loop exit
PB: predicated region body
PF: predicated region fallthrough
CT: control target
= control target key end

     0   :  { %v1434_v2 = vmov 0.0   ;;  %vm1435_vm0 = vmmov 0   ;;  %vm34_vm1 = vcmask 261120   ;;  %vm95_vm2 = vcmask 130048   ;;  %s1436_s17 = smov 120   ;;  %s1437_s18 = smov 116   ;;  %s1764_s2 = inlined_call_operand.vmem [shape: f32[200,32], index: 2, kind: input, shape index: {}]   ;;  %s1765_s1 = inlined_call_operand.vmem [shape: f32[2,16], index: 1, kind: input, shape index: {}]   ;;  %s1766_s0 = inlined_call_operand.vmem [shape: f32[32,32], index: 0, kind: input, shape index: {}]   ;;  %s1767_s4 = inlined_call_operand.vmem [shape: f32[2,2,16,16], index: 4, kind: output, shape index: {1}]   ;;  %s1768_s3 = inlined_call_operand.vmem [shape: f32[32,16], index: 3, kind: output, shape index: {0}]  }
   0x1   :  { %v23_v0 = vld [vmem:[%s1764_s2 + $0x10] sm:$0xff]  ;;  %v24_v1 = vld [vmem:[%s1764_s2 + $0x18] sm:$0xff]  ;;  %1284 = vmatprep.subr.bf16.mxu1 %v1434_v2  ;;  %v91_v3 = vld [vmem:[%s1764_s2 + $0x28] sm:$0xff]  ;;  %1286 = vmatprep.mubr.msk.bf16.mxu1 %vm1435_vm0, %v1434_v2  ;;  %v139_v18 = vlaneseq  ;;  %vm153_vm3 = vcmask 64512   ;;  %vm233_vm4 = vcmask 1043456   ;;  %s1438_s19 = smov 124  }
   0x2   :  { %v28_v4 = vpack.c.bf16 %v24_v1, %v23_v0  ;;  %v92_v5 = vld [vmem:[%s1764_s2 + $0x30] sm:$0xff]  ;;  %v21_v6 = vld [vmem:[%s1764_s2] sm:$0xff]  ;;  %v22_v7 = vld [vmem:[%s1764_s2 + $0x8] sm:$0xff]  ;;  %vm293_vm5 = vcmask 31744  }
   0x3   :  { %v94_v8 = vpack.c.bf16 %v92_v5, %v91_v3  ;;  %v27_v9 = vpack.c.bf16 %v22_v7, %v21_v6  ;;  %v90_v10 = vld [vmem:[%s1765_s1] sm:$0x3]  ;;  %v18_v12 = vld [vmem:[%s1766_s0 + $0x8] sm:$0xff]  ;;  %v19_v15 = vld [vmem:[%s1766_s0 + $0x10] sm:$0xff]  ;;  %v140_v19 = vshrl.u32 %v139_v18, 7 }
   0x4   :  { %v17_v11 = vld [vmem:[%s1766_s0] sm:$0xff]  ;;  %1276 = vmatprep.subr.bf16.mxu0 %v28_v4  ;;  %v93_v13 = vpack.c.bf16 %v90_v10, %v90_v10  ;;  %v20_v16 = vld [vmem:[%s1766_s0 + $0x18] sm:$0xff]  ;;  %v223_v1 = vld [vmem:[%s1764_s2 + $0x48] sm:$0xff] }
   0x5   :  { %v25_v14 = vpack.c.bf16 %v18_v12, %v17_v11  ;;  %1277 = vmatpush3.bf16.msra.mxu0 %v28_v4  ;;  %1285 = vmatpush3.bf16.msra.mxu1 %v94_v8  ;;  %v26_v17 = vpack.c.bf16 %v20_v16, %v19_v15  ;;  %v145_v20 = vsub.s32 1, %v140_v19  ;;  %v141_v22 = vsub.s32 0, %v140_v19  ;;  %v1200_v24 = vld [vmem:[%s1764_s2 + $0x20] ss:$0 sm:$0xff]  ;;  %v1204_v19 = vld [vmem:[%s1764_s2 + $0x38] ss:$0 sm:$0xff] }
   0x6   :  { %1278 = vmatprep.subr.bf16.mxu0 %v27_v9  ;;  %v226_v3 = vpack.c.bf16 %v223_v1, %v223_v1 }
   0x7   :  { %1280 = vmatprep.mubr.msk.bf16.mxu0 %vm34_vm1, %v25_v14 }
   0x8   :  { %1287 = vmatmul.mubr.msk.bf16.vlgmr.msra.gmra.mxu1 %vm95_vm2, %v93_v13  ;;  %1376 = vmatprep.subr.msk.bf16.mxu1 %vm233_vm4, %v226_v3  ;;  %v235_v4 = vsel %vm233_vm4, %v226_v3, 0 }
   0x9   :  { %1279 = vmatpush3.bf16.msra.mxu0 %v27_v9  ;;  %1291 = vmatpush3.bf16.msra.mxu1 %v235_v4 }
   0xa   :  { %1296 = vmatprep.subr.bf16.mxu0 %v1434_v2  ;;  %1302 = vmatprep.subr.bf16.mxu1 %v1434_v2 }
   0xc   :  { %1281 = vmatmul.mubr.msk.bf16.vlgmr.msra.gmra.mxu0 %vm34_vm1, %v26_v17 }
   0xd   :  { %1298 = vmatprep.mubr.msk.bf16.mxu0 %vm1435_vm0, %v1434_v2 }
  0xc8   :  { %v133_v21 = vpop.f32.mrf.mxu1 }
  0xc9   :  { %v146_v25 = vrot.slane %v133_v21, %v145_v20  ;;  %v142_v28 = vrot.slane %v133_v21, %v141_v22 }
  0xca   :  { %v1288_v23 = vpop.f32.mrf.mxu1 }
  0xcc   :  { %v1282_v26 = vpop.f32.mrf.mxu0  ;;  %v136_v27 = vpop.f32.mrf.mxu1 }
  0xcd   :  { %v84_v29 = vadd.f32 %v1282_v26, %v1200_v24 }
  0xce   :  { %v75_v30 = vpop.f32.mrf.mxu0  ;;  %v1289_v31 = vpop.f32.mrf.mxu1 }
  0xcf   :  { %v1509_v32 = vadd.f32 %v146_v25, %v84_v29  ;;  %v76_v33 = vadd.f32 %v1200_v24, %v75_v30 }
  0xd0   :  { %v1283_v34 = vpop.f32.mrf.mxu0 }
  0xd1   :  { %v1511_v35 = vadd.f32 %v142_v28, %v76_v33  ;;  %v87_v36 = vadd.f32 %v1283_v34, %v1200_v24  ;;  %v160_v37 = vsel %vm153_vm3, %v1509_v32, 0.0 }
  0xd2   :  { %161 = vadd.xlane.f32.xlu1 %v160_v37  ;;  %v78_v38 = vpop.f32.mrf.mxu0 }
  0xd3   :  { %v1515_v39 = vadd.f32 %v146_v25, %v87_v36  ;;  %v79_v40 = vadd.f32 %v1200_v24, %v78_v38  ;;  %v154_v41 = vsel %vm153_vm3, %v1511_v35, 0.0  ;;  %v1205_v25 = vld [vmem:[%s1764_s2 + $0x40] ss:$0 sm:$0xff] }
  0xd4   :  { %155 = vadd.xlane.f32.xlu0 %v154_v41 }
  0xd5   :  { %v1519_v42 = vadd.f32 %v142_v28, %v79_v40  ;;  %v163_v43 = vsel %vm153_vm3, %v1515_v39, 0.0 }
  0xd6   :  { %164 = vadd.xlane.f32.xlu1 %v163_v43 }
  0xd7   :  { %v157_v44 = vsel %vm153_vm3, %v1519_v42, 0.0 }
  0xd8   :  { %158 = vadd.xlane.f32.xlu0 %v157_v44 }
 0x15b   :  { %v162_v45 = vpop.xlane.xlu1 %161 }
 0x15c   :  { %v169_v46 = vmul.f32 0.125, %v162_v45 }
 0x15d   :  { %v156_v47 = vpop.xlane.xlu0 %155 }
 0x15e   :  { %v167_v48 = vmul.f32 0.125, %v156_v47  ;;  %v173_v50 = vsub.f32 %v1509_v32, %v169_v46  ;;  %v453_v47 = vld [vmem:[%s1764_s2 + $0x50] sm:$0xff] }
 0x15f   :  { %v165_v49 = vpop.xlane.xlu1 %164 }
 0x160   :  { %v171_v51 = vsub.f32 %v1511_v35, %v167_v48  ;;  %v170_v52 = vmul.f32 0.125, %v165_v49  ;;  %v177_v59 = vmul.f32 %v173_v50, %v173_v50 }
 0x161   :  { %v159_v53 = vpop.xlane.xlu0 %158 }
 0x162   :  { %v168_v54 = vmul.f32 0.125, %v159_v53  ;;  %v175_v55 = vmul.f32 %v171_v51, %v171_v51  ;;  %v174_v56 = vsub.f32 %v1515_v39, %v170_v52  ;;  %v185_v61 = vsel %vm153_vm3, %v177_v59, 0.0  ;;  %v670_v53 = vld [vmem:[%s1764_s2 + $0x58] sm:$0xff] }
 0x164   :  { %v172_v57 = vsub.f32 %v1519_v42, %v168_v54  ;;  %v179_v58 = vsel %vm153_vm3, %v175_v55, 0.0  ;;  %v178_v63 = vmul.f32 %v174_v56, %v174_v56  ;;  %v671_v55 = vpack.c.bf16 %v670_v53, %v670_v53 }
 0x165   :  { %180 = vadd.xlane.f32.xlu0 %v179_v58 }
 0x166   :  { %v176_v60 = vmul.f32 %v172_v57, %v172_v57  ;;  %v188_v0 = vsel %vm153_vm3, %v178_v63, 0.0  ;;  %v673_v58 = vsel %vm233_vm4, %v671_v55, 0 }
 0x168   :  { %v182_v62 = vsel %vm153_vm3, %v176_v60, 0.0 }
 0x169   :  { %186 = vadd.xlane.f32.xlu0 %v185_v61  ;;  %183 = vadd.xlane.f32.xlu1 %v182_v62 }
 0x16d   :  { %189 = vadd.xlane.f32.xlu1 %v188_v0 }
 0x1ee   :  { %v181_v5 = vpop.xlane.xlu0 %180 }
 0x1ef   :  { %v191_v6 = vmul.f32 0.125, %v181_v5 }
 0x1f1   :  { %v195_v7 = vadd.f32 1e-05, %v191_v6 }
 0x1f2   :  { %v184_v8 = vpop.xlane.xlu1 %183  ;;  %v187_v9 = vpop.xlane.xlu0 %186 }
 0x1f3   :  { %1386 = vrsqrt.f32 %v195_v7  ;;  %v192_v10 = vmul.f32 0.125, %v184_v8  ;;  %v193_v11 = vmul.f32 0.125, %v187_v9  ;;  %v286_v7 = vld [vmem:[%s1764_s2 + $0xb8] sm:$0xff] }
 0x1f4   :  { %vm395_vm6 = vcmp.gt.f32.partialorder %v286_v7, 0.5 }
 0x1f5   :  { %v196_v12 = vadd.f32 1e-05, %v192_v10  ;;  %v197_v13 = vadd.f32 1e-05, %v193_v11 }
 0x1f6   :  { %v190_v14 = vpop.xlane.xlu1 %189 }
 0x1f7   :  { %1388 = vrsqrt.f32 %v196_v12  ;;  %v194_v15 = vmul.f32 0.125, %v190_v14  ;;  %v287_v14 = vld [vmem:[%s1764_s2 + $0xc0] sm:$0xff] }
 0x1f8   :  { %1390 = vrsqrt.f32 %v197_v13  ;;  %vm396_vm7 = vcmp.gt.f32.partialorder %v287_v14, 0.5 }
 0x1f9   :  { %v198_v16 = vadd.f32 1e-05, %v194_v15 }
 0x1fb   :  { %1392 = vrsqrt.f32 %v198_v16 }
 0x200   :  { %v1387_v17 = vpop.eup %1386 }
 0x201   :  { %v203_v18 = vmul.f32 %v1387_v17, %v171_v51 }
 0x203   :  { %v211_v23 = vmul.f32 %v1204_v19, %v203_v18 }
 0x204   :  { %v1389_v20 = vpop.eup %1388 }
 0x205   :  { %v1391_v21 = vpop.eup %1390  ;;  %v204_v22 = vmul.f32 %v1389_v20, %v172_v57  ;;  %v219_v29 = vadd.f32 %v1205_v25, %v211_v23 }
 0x206   :  { %v205_v24 = vmul.f32 %v1391_v21, %v173_v50  ;;  %v454_v50 = vpack.c.bf16 %v453_v47, %v453_v47 }
 0x207   :  { %v212_v26 = vmul.f32 %v1204_v19, %v204_v22 }
 0x208   :  { %v1393_v27 = vpop.eup %1392  ;;  %v213_v31 = vmul.f32 %v1204_v19, %v205_v24  ;;  %v456_v57 = vsel %vm233_vm4, %v454_v50, 0 }
 0x209   :  { %v206_v28 = vmul.f32 %v1393_v27, %v174_v56  ;;  %v220_v30 = vadd.f32 %v1205_v25, %v212_v26 }
 0x20a   :  { %v221_v36 = vadd.f32 %v1205_v25, %v213_v31 }
 0x20b   :  { %v224_v33 = vpack.c.bf16 %v220_v30, %v219_v29  ;;  %v214_v34 = vmul.f32 %v1204_v19, %v206_v28 }
 0x20d   :  { %1292 = vmatprep.mubr.msk.bf16.mxu1 %vm153_vm3, %v224_v33  ;;  %v222_v37 = vadd.f32 %v1205_v25, %v214_v34 }
 0x20f   :  { %v225_v38 = vpack.c.bf16 %v222_v37, %v221_v36 }
 0x211   :  { %1293 = vmatmul.mubr.msk.bf16.vlgmr.msra.gmra.mxu1 %vm153_vm3, %v225_v38 }
 0x212   :  { %1304 = vmatprep.mubr.msk.bf16.mxu1 %vm1435_vm0, %v1434_v2 }
 0x2d1   :  { %v1294_v40 = vpop.f32.mrf.mxu1 }
 0x2d3   :  { %v271_v41 = vpop.f32.mrf.mxu1 }
 0x2d5   :  { %v1295_v43 = vpop.f32.mrf.mxu1 }
 0x2d6   :  { %v289_v44 = vpack.c.bf16 %v1295_v43, %v1294_v40 }
 0x2d7   :  { %v274_v45 = vpop.f32.mrf.mxu1 }
 0x2d8   :  { %v288_v46 = vpack.c.bf16 %v274_v45, %v271_v41  ;;  %342 = vrot.lane.b32.xlu1 %v289_v44, %s1436_s17 }
 0x2da   :  { %291 = vrot.lane.b32.xlu0 %v288_v46, %s1436_s17 }
 0x2dc   :  { %513 = vrot.lane.b32.xlu1 %v288_v46, %s1437_s18 }
 0x2de   :  { %511 = vrot.lane.b32.xlu0 %v288_v46, %s1438_s19 }
 0x2e0   :  { %564 = vrot.lane.b32.xlu1 %v289_v44, %s1437_s18 }
 0x2e4   :  { %562 = vrot.lane.b32.xlu1 %v289_v44, %s1438_s19 }
 0x34a   :  { %v343_v48 = vpop.permute.xlu1 %342 }
 0x34b   :  { %v348_v49 = vsel %vm293_vm5, %v343_v48, 0 }
 0x34c   :  { %1303 = vmatpush3.bf16.xpose.msra.mxu1 %v348_v49  ;;  %v292_v51 = vpop.permute.xlu0 %291 }
 0x34d   :  { %v298_v52 = vsel %vm293_vm5, %v292_v51, 0  ;;  %1314 = vmatprep.subr.bf16.mxu1 %v1434_v2 }
 0x34e   :  { %1297 = vmatpush3.bf16.xpose.msra.mxu0 %v298_v52  ;;  %v514_v54 = vpop.permute.xlu1 %513 }
 0x34f   :  { %1377 = vmatprep.subr.msk.bf16.mxu0 %vm233_vm4, %v454_v50  ;;  %v519_v56 = vsel %vm293_vm5, %v514_v54, 0 }
 0x350   :  { %v512_v59 = vpop.permute.xlu0 %511 }
 0x352   :  { %v565_v60 = vpop.permute.xlu1 %564 }
 0x353   :  { %1305 = vmatmul.mubr.msk.bf16.vlgmr.msra.gmra.mxu1 %vm293_vm5, %v289_v44  ;;  %v570_v61 = vsel %vm293_vm5, %v565_v60, 0 }
 0x354   :  { %1315 = vmatpush3.bf16.xpose.msra.mxu1 %v519_v56  ;;  %1316 = vmatprep.mubr.msk.bf16.mxu1 %vm1435_vm0, %v1434_v2 }
 0x355   :  { %1299 = vmatmul.mubr.msk.bf16.vlgmr.msra.gmra.mxu0 %vm293_vm5, %v288_v46  ;;  %1378 = vmatprep.subr.msk.bf16.mxu1 %vm233_vm4, %v671_v55 }
 0x356   :  { %1309 = vmatpush3.bf16.msra.mxu0 %v456_v57  ;;  %1310 = vmatprep.mubr.msk.bf16.mxu0 %vm153_vm3, %v224_v33  ;;  %v563_v62 = vpop.permute.xlu1 %562 }
 0x357   :  { %1320 = vmatprep.subr.bf16.mxu0 %v1434_v2 }
 0x35b   :  { %1317 = vmatmul.mubr.msk.bf16.vlgmr.msra.gmra.mxu1 %vm293_vm5, %v512_v59 }
 0x35c   :  { %1328 = vmatprep.mubr.msk.bf16.mxu1 %vm153_vm3, %v224_v33  ;;  %1327 = vmatpush3.bf16.msra.mxu1 %v673_v58 }
 0x35d   :  { %1311 = vmatmul.mubr.msk.bf16.vlgmr.msra.gmra.mxu0 %vm153_vm3, %v225_v38  ;;  %1338 = vmatprep.subr.bf16.mxu1 %v1434_v2 }
 0x35e   :  { %1321 = vmatpush3.bf16.xpose.msra.mxu0 %v570_v61  ;;  %1322 = vmatprep.mubr.msk.bf16.mxu0 %vm1435_vm0, %v1434_v2 }
 0x35f   :  { %1332 = vmatprep.subr.bf16.mxu0 %v1434_v2 }
 0x363   :  { %1329 = vmatmul.mubr.msk.bf16.vlgmr.msra.gmra.mxu1 %vm153_vm3, %v225_v38 }
 0x364   :  { %1340 = vmatprep.mubr.msk.bf16.mxu1 %vm1435_vm0, %v1434_v2 }
 0x365   :  { %1323 = vmatmul.mubr.msk.bf16.vlgmr.msra.gmra.mxu0 %vm293_vm5, %v563_v62 }
 0x366   :  { %1334 = vmatprep.mubr.msk.bf16.mxu0 %vm1435_vm0, %v1434_v2 }
 0x413   :  { %v384_v63 = vpop.f32.mrf.mxu1 }
 0x414   :  { %v393_v53 = vmul.f32 0.5, %v384_v63 }
 0x415   :  { %v334_v0 = vpop.f32.mrf.mxu0  ;;  %v1306_v1 = vpop.f32.mrf.mxu1 }
 0x416   :  { %v391_v46 = vmul.f32 0.5, %v334_v0  ;;  %v403_v56 = vsel %vm395_vm6, -1e+09, %v393_v53 }
 0x417   :  { %v1300_v3 = vpop.f32.mrf.mxu0  ;;  %v387_v4 = vpop.f32.mrf.mxu1  ;;  %v411_v57 = vsel %vm95_vm2, %v403_v56, -inf }
 0x418   :  { %v394_v27 = vmul.f32 0.5, %v387_v4  ;;  %v401_v54 = vsel %vm395_vm6, -1e+09, %v391_v46 }
 0x419   :  { %v337_v5 = vpop.f32.mrf.mxu0  ;;  %v1307_v6 = vpop.f32.mrf.mxu1  ;;  %v405_v55 = vsel %vm95_vm2, %v401_v54, -inf }
 0x41a   :  { %v392_v18 = vmul.f32 0.5, %v337_v5  ;;  %v404_v41 = vsel %vm396_vm7, -1e+09, %v394_v27 }
 0x41b   :  { %v1301_v8 = vpop.f32.mrf.mxu0  ;;  %v555_v9 = vpop.f32.mrf.mxu1  ;;  %v414_v50 = vsel %vm95_vm2, %v404_v41, -inf }
 0x41c   :  { %v613_v10 = vmul.f32 0.5, %v555_v9  ;;  %v402_v29 = vsel %vm396_vm7, -1e+09, %v392_v18 }
 0x41d   :  { %v1586_v11 = vpop.f32.mrf.mxu0  ;;  %v1318_v12 = vpop.f32.mrf.mxu1  ;;  %v408_v37 = vsel %vm95_vm2, %v402_v29, -inf }
 0x41e   :  { %v617_v13 = vsel %vm395_vm6, -1e+09, %v613_v10 }
 0x41f   :  { %v1592_v15 = vpop.f32.mrf.mxu0  ;;  %v558_v16 = vpop.f32.mrf.mxu1  ;;  %v621_v17 = vsel %vm95_vm2, %v617_v13, -inf }
 0x420   :  { %v614_v19 = vmul.f32 0.5, %v558_v16  ;;  %622 = vmax.xlane.f32.xlu0 %v621_v17 }
 0x421   :  { %v1595_v20 = vpop.f32.mrf.mxu0  ;;  %v1319_v21 = vpop.f32.mrf.mxu1 }
 0x422   :  { %v510_v22 = vpack.c.bf16 %v1595_v20, %v1586_v11  ;;  %v618_v23 = vsel %vm396_vm7, -1e+09, %v614_v19 }
 0x423   :  { %v1600_v24 = vpop.f32.mrf.mxu0  ;;  %v1330_v25 = vpop.f32.mrf.mxu1  ;;  %v624_v26 = vsel %vm95_vm2, %v618_v23, -inf }
 0x424   :  { %v509_v28 = vpack.c.bf16 %v1600_v24, %v1592_v15  ;;  %625 = vmax.xlane.f32.xlu1 %v624_v26 }
 0x425   :  { %v606_v30 = vpop.f32.mrf.mxu0  ;;  %v709_v31 = vpop.f32.mrf.mxu1 }
 0x426   :  { %v615_v33 = vmul.f32 0.5, %v606_v30 }
 0x427   :  { %v1324_v34 = vpop.f32.mrf.mxu0  ;;  %v1331_v36 = vpop.f32.mrf.mxu1 }
 0x428   :  { %v727_v38 = vpack.c.bf16 %v1331_v36, %v1330_v25  ;;  %409 = vmax.xlane.f32.xlu1 %v408_v37  ;;  %v619_v40 = vsel %vm395_vm6, -1e+09, %v615_v33 }
 0x429   :  { %v609_v43 = vpop.f32.mrf.mxu0  ;;  %v712_v44 = vpop.f32.mrf.mxu1  ;;  %v627_v45 = vsel %vm95_vm2, %v619_v40, -inf }
 0x42a   :  { %v616_v47 = vmul.f32 0.5, %v609_v43  ;;  %v726_v48 = vpack.c.bf16 %v712_v44, %v709_v31  ;;  %628 = vmax.xlane.f32.xlu0 %v627_v45  ;;  %1339 = vmatpush3.bf16.msra.mxu1 %v727_v38 }
 0x42b   :  { %v1325_v49 = vpop.f32.mrf.mxu0  ;;  %1350 = vmatprep.subr.bf16.mxu1 %v1434_v2 }
 0x42c   :  { %415 = vmax.xlane.f32.xlu1 %v414_v50  ;;  %1333 = vmatpush3.bf16.msra.mxu0 %v726_v48  ;;  %v620_v51 = vsel %vm396_vm7, -1e+09, %v616_v47 }
 0x42d   :  { %v630_v52 = vsel %vm95_vm2, %v620_v51, -inf  ;;  %1344 = vmatprep.subr.bf16.mxu0 %v1434_v2 }
 0x42e   :  { %631 = vmax.xlane.f32.xlu0 %v630_v52 }
 0x432   :  { %406 = vmax.xlane.f32.xlu0 %v405_v55 }
 0x436   :  { %412 = vmax.xlane.f32.xlu0 %v411_v57 }
 0x4a9   :  { %v623_v58 = vpop.xlane.xlu0 %622 }
 0x4aa   :  { %v633_v59 = vsub.f32 %v617_v13, %v623_v58 }
 0x4ac   :  { %v637_v60 = vmul.f32 1.442695, %v633_v59 }
 0x4ad   :  { %v626_v61 = vpop.xlane.xlu1 %625 }
 0x4ae   :  { %1394 = vpow2.f32 %v637_v60  ;;  %v634_v62 = vsub.f32 %v618_v23, %v626_v61 }
 0x4b0   :  { %v639_v0 = vmul.f32 1.442695, %v634_v62 }
 0x4b1   :  { %v410_v1 = vpop.xlane.xlu1 %409 }
 0x4b2   :  { %1396 = vpow2.f32 %v639_v0  ;;  %v418_v4 = vsub.f32 %v402_v29, %v410_v1 }
 0x4b3   :  { %v629_v63 = vpop.xlane.xlu0 %628 }
 0x4b4   :  { %v635_v3 = vsub.f32 %v619_v40, %v629_v63  ;;  %v423_v9 = vmul.f32 1.442695, %v418_v4 }
 0x4b5   :  { %v416_v6 = vpop.xlane.xlu1 %415 }
 0x4b6   :  { %v641_v5 = vmul.f32 1.442695, %v635_v3  ;;  %v420_v10 = vsub.f32 %v404_v41, %v416_v6 }
 0x4b7   :  { %v632_v8 = vpop.xlane.xlu0 %631 }
 0x4b8   :  { %1398 = vpow2.f32 %v641_v5  ;;  %v636_v7 = vsub.f32 %v620_v51, %v632_v8  ;;  %v427_v18 = vmul.f32 1.442695, %v420_v10 }
 0x4ba   :  { %v643_v12 = vmul.f32 1.442695, %v636_v7 }
 0x4bb   :  { %v1395_v14 = vpop.eup %1394  ;;  %v407_v13 = vpop.xlane.xlu0 %406 }
 0x4bc   :  { %1400 = vpow2.f32 %v643_v12  ;;  %v417_v16 = vsub.f32 %v401_v54, %v407_v13  ;;  %v645_v17 = vsel %vm95_vm2, %v1395_v14, 0.0 }
 0x4bd   :  { %646 = vadd.xlane.f32.xlu0 %v645_v17  ;;  %1402 = vpow2.f32 %v423_v9 }
 0x4be   :  { %v421_v19 = vmul.f32 1.442695, %v417_v16 }
 0x4bf   :  { %v1397_v21 = vpop.eup %1396  ;;  %v413_v23 = vpop.xlane.xlu0 %412 }
 0x4c0   :  { %1404 = vpow2.f32 %v421_v19  ;;  %v419_v25 = vsub.f32 %v403_v56, %v413_v23  ;;  %v648_v26 = vsel %vm95_vm2, %v1397_v21, 0.0 }
 0x4c1   :  { %649 = vadd.xlane.f32.xlu1 %v648_v26  ;;  %1406 = vpow2.f32 %v427_v18 }
 0x4c2   :  { %v425_v27 = vmul.f32 1.442695, %v419_v25 }
 0x4c4   :  { %1408 = vpow2.f32 %v425_v27 }
 0x4c5   :  { %v1399_v29 = vpop.eup %1398 }
 0x4c6   :  { %v651_v30 = vsel %vm95_vm2, %v1399_v29, 0.0 }
 0x4c7   :  { %652 = vadd.xlane.f32.xlu0 %v651_v30 }
 0x4c9   :  { %v1401_v31 = vpop.eup %1400 }
 0x4ca   :  { %v654_v33 = vsel %vm95_vm2, %v1401_v31, 0.0  ;;  %v1403_v34 = vpop.eup %1402 }
 0x4cb   :  { %655 = vadd.xlane.f32.xlu1 %v654_v33  ;;  %v432_v38 = vsel %vm95_vm2, %v1403_v34, 0.0 }
 0x4cd   :  { %v1405_v36 = vpop.eup %1404 }
 0x4ce   :  { %v429_v37 = vsel %vm95_vm2, %v1405_v36, 0.0  ;;  %v1407_v40 = vpop.eup %1406 }
 0x4cf   :  { %430 = vadd.xlane.f32.xlu0 %v429_v37  ;;  %433 = vadd.xlane.f32.xlu1 %v432_v38  ;;  %v438_v44 = vsel %vm95_vm2, %v1407_v40, 0.0 }
 0x4d1   :  { %v1409_v41 = vpop.eup %1408 }
 0x4d2   :  { %v435_v43 = vsel %vm95_vm2, %v1409_v41, 0.0 }
 0x4d3   :  { %436 = vadd.xlane.f32.xlu0 %v435_v43  ;;  %439 = vadd.xlane.f32.xlu1 %v438_v44 }
 0x546   :  { %v647_v45 = vpop.xlane.xlu0 %646 }
 0x547   :  { %1410 = vrcp.f32 %v647_v45 }
 0x54a   :  { %v650_v46 = vpop.xlane.xlu1 %649 }
 0x54b   :  { %1412 = vrcp.f32 %v650_v46 }
 0x550   :  { %v653_v47 = vpop.xlane.xlu0 %652 }
 0x551   :  { %1414 = vrcp.f32 %v653_v47 }
 0x554   :  { %v1411_v48 = vpop.eup %1410  ;;  %v656_v49 = vpop.xlane.xlu1 %655 }
 0x555   :  { %1416 = vrcp.f32 %v656_v49  ;;  %v661_v50 = vmul.f32 %v1411_v48, %v1395_v14 }
 0x557   :  { %1214 = vst.msk [vmem:[%s1767_s4 + $0x20] sm:$0xff] %vm95_vm2, %v661_v50 }
 0x558   :  { %v1413_v51 = vpop.eup %1412  ;;  %v431_v52 = vpop.xlane.xlu0 %430 }
 0x559   :  { %v434_v53 = vpop.xlane.xlu1 %433  ;;  %1418 = vrcp.f32 %v431_v52  ;;  %v662_v54 = vmul.f32 %v1413_v51, %v1397_v21 }
 0x55a   :  { %1420 = vrcp.f32 %v434_v53 }
 0x55b   :  { %1215 = vst.msk [vmem:[%s1767_s4 + $0x28] sm:$0xff] %vm95_vm2, %v662_v54  ;;  %v724_v55 = vpack.c.bf16 %v662_v54, %v661_v50 }
 0x55c   :  { %v437_v56 = vpop.xlane.xlu0 %436 }
 0x55d   :  { %v440_v57 = vpop.xlane.xlu1 %439  ;;  %1422 = vrcp.f32 %v437_v56  ;;  %1335 = vmatmul.mubr.msk.bf16.vlgmr.msra.gmra.mxu0 %vm95_vm2, %v724_v55 }
 0x55e   :  { %v1415_v58 = vpop.eup %1414  ;;  %1424 = vrcp.f32 %v440_v57  ;;  %1345 = vmatpush3.bf16.msra.mxu0 %v509_v28  ;;  %1346 = vmatprep.mubr.msk.bf16.mxu0 %vm1435_vm0, %v1434_v2  ;;  %v978_v57 = vld [vmem:[%s1764_s2 + $0x70] sm:$0xff] }
 0x55f   :  { %v663_v59 = vmul.f32 %v1415_v58, %v1399_v29  ;;  %v981_v58 = vpack.c.bf16 %v978_v57, %v978_v57 }
 0x561   :  { %1216 = vst.msk [vmem:[%s1767_s4 + $0x30] sm:$0xff] %vm95_vm2, %v663_v59  ;;  %1379 = vmatprep.subr.msk.bf16.mxu0 %vm233_vm4, %v981_v58 }
 0x562   :  { %v1417_v60 = vpop.eup %1416 }
 0x563   :  { %v664_v61 = vmul.f32 %v1417_v60, %v1401_v31 }
 0x565   :  { %1217 = vst.msk [vmem:[%s1767_s4 + $0x38] sm:$0xff] %vm95_vm2, %v664_v61  ;;  %v725_v62 = vpack.c.bf16 %v664_v61, %v663_v59  ;;  %v994_v59 = vsel %vm233_vm4, %v981_v58, 0  ;;  %v1229_v58 = vld [vmem:[%s1764_s2 + $0xa0] ss:$0 sm:$0xff] }
 0x566   :  { %v1419_v0 = vpop.eup %1418 }
 0x567   :  { %v1421_v15 = vpop.eup %1420  ;;  %1341 = vmatmul.mubr.msk.bf16.vlgmr.msra.gmra.mxu1 %vm95_vm2, %v725_v62  ;;  %v445_v24 = vmul.f32 %v1419_v0, %v1405_v36 }
 0x568   :  { %1351 = vmatpush3.bf16.msra.mxu1 %v510_v22  ;;  %v446_v28 = vmul.f32 %v1421_v15, %v1403_v34  ;;  %1352 = vmatprep.mubr.msk.bf16.mxu1 %vm1435_vm0, %v1434_v2 }
 0x569   :  { %449 = vst.msk [vmem:[%s1767_s4] sm:$0xff] %vm95_vm2, %v445_v24 }
 0x56a   :  { %v1423_v1 = vpop.eup %1422  ;;  %450 = vst.msk [vmem:[%s1767_s4 + $0x8] sm:$0xff] %vm95_vm2, %v446_v28  ;;  %v507_v63 = vpack.c.bf16 %v446_v28, %v445_v24 }
 0x56b   :  { %v1425_v3 = vpop.eup %1424  ;;  %v447_v4 = vmul.f32 %v1423_v1, %v1409_v41 }
 0x56c   :  { %1347 = vmatmul.mubr.msk.bf16.vlgmr.msra.gmra.mxu0 %vm95_vm2, %v507_v63  ;;  %v448_v11 = vmul.f32 %v1425_v3, %v1407_v40 }
 0x56d   :  { %451 = vst.msk [vmem:[%s1767_s4 + $0x10] sm:$0xff] %vm95_vm2, %v447_v4  ;;  %1357 = vmatpush3.bf16.msra.mxu0 %v994_v59 }
 0x56e   :  { %452 = vst.msk [vmem:[%s1767_s4 + $0x18] sm:$0xff] %vm95_vm2, %v448_v11  ;;  %v508_v2 = vpack.c.bf16 %v448_v11, %v447_v4 }
 0x570   :  { %1353 = vmatmul.mubr.msk.bf16.vlgmr.msra.gmra.mxu1 %vm95_vm2, %v508_v2 }
 0x61d   :  { %v765_v20 = vpop.f32.mrf.mxu0 }
 0x61f   :  { %v1336_v22 = vpop.f32.mrf.mxu0 }
 0x620   :  { %v1224_v22 = vld [vmem:[%s1764_s2 + $0x60] ss:$0 sm:$0xff] }
 0x621   :  { %v768_v5 = vpop.f32.mrf.mxu0 }
 0x623   :  { %v1337_v6 = vpop.f32.mrf.mxu0 }
 0x627   :  { %v809_v8 = vpop.f32.mrf.mxu1 }
 0x629   :  { %v1342_v7 = vpop.f32.mrf.mxu1 }
 0x62b   :  { %v812_v9 = vpop.f32.mrf.mxu1 }
 0x62c   :  { %v853_v10 = vpop.f32.mrf.mxu0 }
 0x62d   :  { %v854_v12 = vadd.f32 %v853_v10, %v765_v20  ;;  %v1343_v14 = vpop.f32.mrf.mxu1  ;;  %v1225_v10 = vld [vmem:[%s1764_s2 + $0x68] ss:$0 sm:$0xff] }
 0x62e   :  { %v1348_v13 = vpop.f32.mrf.mxu0 }
 0x62f   :  { %v1674_v16 = vadd.f32 %v854_v12, %v1511_v35 }
 0x630   :  { %v856_v17 = vpop.f32.mrf.mxu0  ;;  %v897_v18 = vpop.f32.mrf.mxu1 }
 0x631   :  { %v857_v19 = vadd.f32 %v856_v17, %v768_v5  ;;  %v898_v21 = vadd.f32 %v897_v18, %v809_v8  ;;  %v910_v23 = vsel %vm153_vm3, %v1674_v16, 0.0 }
 0x632   :  { %v1354_v25 = vpop.f32.mrf.mxu1  ;;  %911 = vadd.xlane.f32.xlu0 %v910_v23  ;;  %v1349_v26 = vpop.f32.mrf.mxu0 }
 0x633   :  { %v1679_v27 = vadd.f32 %v857_v19, %v1519_v42  ;;  %v1682_v29 = vadd.f32 %v898_v21, %v1509_v32 }
 0x634   :  { %v900_v30 = vpop.f32.mrf.mxu1 }
 0x635   :  { %v901_v31 = vadd.f32 %v900_v30, %v812_v9  ;;  %v916_v35 = vsel %vm153_vm3, %v1682_v29, 0.0  ;;  %v913_v33 = vsel %vm153_vm3, %v1679_v27, 0.0 }
 0x636   :  { %v1355_v34 = vpop.f32.mrf.mxu1  ;;  %917 = vadd.xlane.f32.xlu0 %v916_v35  ;;  %914 = vadd.xlane.f32.xlu1 %v913_v33  ;;  %v1052_v35 = vld [vmem:[%s1764_s2 + $0x98] sm:$0xff] }
 0x637   :  { %v1689_v36 = vadd.f32 %v901_v31, %v1515_v39  ;;  %v1051_v31 = vld [vmem:[%s1764_s2 + $0x90] sm:$0xff]  ;;  %v1049_v34 = vld [vmem:[%s1764_s2 + $0x80] sm:$0xff] }
 0x638   :  { %v1056_v33 = vpack.c.bf16 %v1052_v35, %v1051_v31 }
 0x639   :  { %v919_v42 = vsel %vm153_vm3, %v1689_v36, 0.0 }
 0x63a   :  { %920 = vadd.xlane.f32.xlu1 %v919_v42  ;;  %1362 = vmatprep.subr.bf16.mxu1 %v1056_v33  ;;  %v1050_v42 = vld [vmem:[%s1764_s2 + $0x88] sm:$0xff] }
 0x63b   :  { %1363 = vmatpush3.bf16.msra.mxu1 %v1056_v33 }
 0x6bb   :  { %v912_v32 = vpop.xlane.xlu0 %911 }
 0x6bc   :  { %v922_v37 = vmul.f32 0.125, %v912_v32  ;;  %v1055_v32 = vpack.c.bf16 %v1050_v42, %v1049_v34 }
 0x6be   :  { %v926_v38 = vsub.f32 %v1674_v16, %v922_v37  ;;  %1364 = vmatprep.subr.bf16.mxu1 %v1055_v32 }
 0x6bf   :  { %v918_v40 = vpop.xlane.xlu0 %917  ;;  %v915_v41 = vpop.xlane.xlu1 %914  ;;  %1365 = vmatpush3.bf16.msra.mxu1 %v1055_v32 }
 0x6c0   :  { %v924_v43 = vmul.f32 0.125, %v918_v40  ;;  %v923_v44 = vmul.f32 0.125, %v915_v41  ;;  %v930_v45 = vmul.f32 %v926_v38, %v926_v38  ;;  %v1226_v40 = vld [vmem:[%s1764_s2 + $0x78] ss:$0 sm:$0xff] }
 0x6c2   :  { %v928_v46 = vsub.f32 %v1682_v29, %v924_v43  ;;  %v927_v47 = vsub.f32 %v1679_v27, %v923_v44  ;;  %v934_v39 = vsel %vm153_vm3, %v930_v45, 0.0 }
 0x6c3   :  { %935 = vadd.xlane.f32.xlu0 %v934_v39  ;;  %v921_v48 = vpop.xlane.xlu1 %920 }
 0x6c4   :  { %v925_v49 = vmul.f32 0.125, %v921_v48  ;;  %v932_v50 = vmul.f32 %v928_v46, %v928_v46  ;;  %v931_v51 = vmul.f32 %v927_v47, %v927_v47 }
 0x6c6   :  { %v929_v52 = vsub.f32 %v1689_v36, %v925_v49  ;;  %v940_v53 = vsel %vm153_vm3, %v932_v50, 0.0  ;;  %v937_v54 = vsel %vm153_vm3, %v931_v51, 0.0 }
 0x6c7   :  { %941 = vadd.xlane.f32.xlu0 %v940_v53  ;;  %938 = vadd.xlane.f32.xlu1 %v937_v54  ;;  %v1121_v53 = vld [vmem:[%s1764_s2 + $0xa8] sm:$0xff] }
 0x6c8   :  { %v933_v55 = vmul.f32 %v929_v52, %v929_v52  ;;  %v1124_v54 = vpack.c.bf16 %v1121_v53, %v1121_v53 }
 0x6ca   :  { %v943_v56 = vsel %vm153_vm3, %v933_v55, 0.0  ;;  %1380 = vmatprep.subr.msk.bf16.mxu0 %vm233_vm4, %v1124_v54  ;;  %v1137_v55 = vsel %vm233_vm4, %v1124_v54, 0 }
 0x6cb   :  { %944 = vadd.xlane.f32.xlu1 %v943_v56 }
 0x74c   :  { %v936_v60 = vpop.xlane.xlu0 %935 }
 0x74d   :  { %v946_v61 = vmul.f32 0.125, %v936_v60 }
 0x74f   :  { %v950_v62 = vadd.f32 1e-06, %v946_v61 }
 0x750   :  { %v942_v0 = vpop.xlane.xlu0 %941  ;;  %v939_v15 = vpop.xlane.xlu1 %938 }
 0x751   :  { %1426 = vrsqrt.f32 %v950_v62  ;;  %v948_v24 = vmul.f32 0.125, %v942_v0  ;;  %v947_v28 = vmul.f32 0.125, %v939_v15 }
 0x753   :  { %v952_v1 = vadd.f32 1e-06, %v948_v24  ;;  %v951_v63 = vadd.f32 1e-06, %v947_v28 }
 0x754   :  { %v945_v3 = vpop.xlane.xlu1 %944 }
 0x755   :  { %1428 = vrsqrt.f32 %v952_v1  ;;  %v949_v4 = vmul.f32 0.125, %v945_v3 }
 0x756   :  { %1430 = vrsqrt.f32 %v951_v63 }
 0x757   :  { %v953_v11 = vadd.f32 1e-06, %v949_v4 }
 0x759   :  { %1432 = vrsqrt.f32 %v953_v11  ;;  %v1232_v11 = vld [vmem:[%s1764_s2 + $0xb0] ss:$0 sm:$0xff] }
 0x75e   :  { %v1427_v2 = vpop.eup %1426 }
 0x75f   :  { %v958_v20 = vmul.f32 %v1427_v2, %v926_v38 }
 0x761   :  { %v966_v9 = vmul.f32 %v1224_v22, %v958_v20 }
 0x762   :  { %v1429_v5 = vpop.eup %1428 }
 0x763   :  { %v1431_v6 = vpop.eup %1430  ;;  %v960_v8 = vmul.f32 %v1429_v5, %v928_v46  ;;  %v974_v18 = vadd.f32 %v1225_v10, %v966_v9 }
 0x764   :  { %v959_v7 = vmul.f32 %v1431_v6, %v927_v47 }
 0x765   :  { %v968_v17 = vmul.f32 %v1224_v22, %v960_v8 }
 0x766   :  { %v1433_v12 = vpop.eup %1432  ;;  %v967_v14 = vmul.f32 %v1224_v22, %v959_v7 }
 0x767   :  { %v961_v13 = vmul.f32 %v1433_v12, %v929_v52  ;;  %v976_v25 = vadd.f32 %v1225_v10, %v968_v17 }
 0x768   :  { %v975_v19 = vadd.f32 %v1225_v10, %v967_v14 }
 0x769   :  { %v969_v21 = vmul.f32 %v1224_v22, %v961_v13 }
 0x76a   :  { %v979_v23 = vpack.c.bf16 %v975_v19, %v974_v18 }
 0x76b   :  { %v977_v26 = vadd.f32 %v1225_v10, %v969_v21 }
 0x76c   :  { %1358 = vmatprep.mubr.msk.bf16.mxu0 %vm153_vm3, %v979_v23 }
 0x76d   :  { %v980_v30 = vpack.c.bf16 %v977_v26, %v976_v25 }
 0x76f   :  { %1359 = vmatmul.mubr.msk.bf16.vlgmr.msra.gmra.mxu0 %vm153_vm3, %v980_v30 }
 0x770   :  { %1371 = vmatpush3.bf16.msra.mxu0 %v1137_v55 }
 0x82f   :  { %v1360_v37 = vpop.f32.mrf.mxu0 }
 0x830   :  { %v1039_v45 = vadd.f32 %v1360_v37, %v1226_v40 }
 0x831   :  { %v1030_v38 = vpop.f32.mrf.mxu0 }
 0x832   :  { %v1031_v43 = vadd.f32 %v1226_v40, %v1030_v38  ;;  %v1047_v50 = vmax.f32 %v1039_v45, 0.0 }
 0x833   :  { %v1361_v41 = vpop.f32.mrf.mxu0 }
 0x834   :  { %v1042_v44 = vadd.f32 %v1361_v41, %v1226_v40  ;;  %v1045_v48 = vmax.f32 %v1031_v43, 0.0 }
 0x835   :  { %v1033_v46 = vpop.f32.mrf.mxu0 }
 0x836   :  { %v1034_v47 = vadd.f32 %v1226_v40, %v1033_v46  ;;  %v1048_v39 = vmax.f32 %v1042_v44, 0.0 }
 0x838   :  { %v1046_v49 = vmax.f32 %v1034_v47, 0.0  ;;  %v1054_v52 = vpack.c.bf16 %v1048_v39, %v1047_v50 }
 0x83a   :  { %v1053_v51 = vpack.c.bf16 %v1046_v49, %v1045_v48 }
 0x83c   :  { %1366 = vmatprep.mubr.msk.bf16.mxu1 %vm34_vm1, %v1053_v51 }
 0x83d   :  { %1367 = vmatmul.mubr.msk.bf16.vlgmr.msra.gmra.mxu1 %vm34_vm1, %v1054_v52 }
 0x8fd   :  { %v1368_v56 = vpop.f32.mrf.mxu1 }
 0x8fe   :  { %v1111_v62 = vadd.f32 %v1368_v56, %v1229_v58 }
 0x8ff   :  { %v1102_v57 = vpop.f32.mrf.mxu1 }
 0x900   :  { %v1103_v60 = vadd.f32 %v1229_v58, %v1102_v57  ;;  %v1119_v63 = vadd.f32 %v1111_v62, %v1682_v29 }
 0x901   :  { %v1369_v59 = vpop.f32.mrf.mxu1 }
 0x902   :  { %v1114_v61 = vadd.f32 %v1369_v59, %v1229_v58  ;;  %v1117_v28 = vadd.f32 %v1103_v60, %v1674_v16 }
 0x903   :  { %v1105_v0 = vpop.f32.mrf.mxu1 }
 0x904   :  { %v1106_v15 = vadd.f32 %v1229_v58, %v1105_v0  ;;  %v1120_v24 = vadd.f32 %v1114_v61, %v1689_v36 }
 0x906   :  { %v1118_v1 = vadd.f32 %v1106_v15, %v1679_v27  ;;  %v1123_v4 = vpack.c.bf16 %v1120_v24, %v1119_v63 }
 0x908   :  { %v1122_v3 = vpack.c.bf16 %v1118_v1, %v1117_v28 }
 0x90a   :  { %1372 = vmatprep.mubr.msk.bf16.mxu0 %vm153_vm3, %v1122_v3 }
 0x90b   :  { %1373 = vmatmul.mubr.msk.bf16.vlgmr.msra.gmra.mxu0 %vm153_vm3, %v1123_v4 }
 0x9cb   :  { %v1374_v2 = vpop.f32.mrf.mxu0 }
 0x9cc   :  { %v1182_v20 = vadd.f32 %v1374_v2, %v1232_v11 }
 0x9cd   :  { %v1173_v22 = vpop.f32.mrf.mxu0 }
 0x9ce   :  { %1190 = vst.msk [vmem:[%s1768_s3 + $0x10] sm:$0xff] %vm95_vm2, %v1182_v20  ;;  %v1174_v16 = vadd.f32 %v1232_v11, %v1173_v22 }
 0x9cf   :  { %v1375_v27 = vpop.f32.mrf.mxu0 }
 0x9d0   :  { %1188 = vst.msk [vmem:[%s1768_s3] sm:$0xff] %vm95_vm2, %v1174_v16  ;;  %v1185_v29 = vadd.f32 %v1375_v27, %v1232_v11 }
 0x9d1   :  { %v1176_v36 = vpop.f32.mrf.mxu0 }
 0x9d2   :  { %1191 = vst.msk [vmem:[%s1768_s3 + $0x18] sm:$0xff] %vm95_vm2, %v1185_v29  ;;  %v1177_v5 = vadd.f32 %v1232_v11, %v1176_v36 }
 0x9d4   :  { %1189 = vst.msk [vmem:[%s1768_s3 + $0x8] sm:$0xff] %vm95_vm2, %v1177_v5 }

</bundles_post_ra>
